<compile_context>
chip_gen: v7x
topology: tpu7x:2x2x1
jax: 0.10.0
libtpu: 0.0.40
codegen_flags: <defaults>
</compile_context>

<pallas_src>
import jax
import jax.numpy as jnp
from jax.experimental import pallas as pl
from jax.experimental.pallas import tpu as pltpu


def _round_up(x, m):
    return ((x + m - 1) // m) * m


def _mlp_actor_kernel(ma_ref, x_ref, w1_ref, b1_ref, w2_ref, b2_ref,
                      w3_ref, b3_ref, o_ref):
    max_action = ma_ref[0, 0]                       # f32 scalar from SMEM

    # Layer 1: Linear + ReLU. bf16 operands into the MXU, f32 accumulation.
    x = x_ref[...].astype(jnp.bfloat16)
    h1 = jnp.dot(x, w1_ref[...], preferred_element_type=jnp.float32)
    h1 = jnp.maximum(h1 + b1_ref[...], 0.0)         # f32 elementwise (VPU)

    # Layer 2: Linear + ReLU.
    h2 = jnp.dot(h1.astype(jnp.bfloat16), w2_ref[...],
                 preferred_element_type=jnp.float32)
    h2 = jnp.maximum(h2 + b2_ref[...], 0.0)

    # Layer 3: Linear + tanh (EUP), scaled by max_action. Lane-dense store.
    h3 = jnp.dot(h2.astype(jnp.bfloat16), w3_ref[...],
                 preferred_element_type=jnp.float32)
    o_ref[...] = (max_action * jnp.tanh(h3 + b3_ref[...])).astype(o_ref.dtype)


def mlp_actor_forward(state, params, max_action, *, block_b=256):
    """state: [B, state_dim] f32. params: dict of f32 w1,b1,w2,b2,w3,b3 with
    weights stored as [in_features, out_features] (transposed vs. PyTorch)."""
    w1, b1 = params["w1"], params["b1"]
    w2, b2 = params["w2"], params["b2"]
    w3, b3 = params["w3"], params["b3"]

    B, state_dim = state.shape
    hidden_dim = w1.shape[1]
    action_dim = w3.shape[1]

    # Lane-dense padded feature dims (exact: zero padding contributes nothing).
    Kp = _round_up(state_dim, 128)
    Hp = _round_up(hidden_dim, 128)
    Ap = _round_up(action_dim, 128)

    # Batch tiling: TB rows per grid step, batch zero-padded to a multiple.
    B8 = _round_up(B, 8)
    TB = min(_round_up(block_b, 8), B8)
    Bp = _round_up(B8, TB)

    f32 = jnp.float32
    bf16 = jnp.bfloat16

    state_p = jnp.pad(state.astype(f32),
                      ((0, Bp - B), (0, Kp - state_dim)))
    w1_p = jnp.pad(w1.astype(bf16),
                   ((0, Kp - state_dim), (0, Hp - hidden_dim)))
    b1_p = jnp.pad(b1.astype(f32), ((0, 0), (0, Hp - hidden_dim)))
    w2_p = jnp.pad(w2.astype(bf16),
                   ((0, Hp - hidden_dim), (0, Hp - hidden_dim)))
    b2_p = jnp.pad(b2.astype(f32), ((0, 0), (0, Hp - hidden_dim)))
    w3_p = jnp.pad(w3.astype(bf16),
                   ((0, Hp - hidden_dim), (0, Ap - action_dim)))
    b3_p = jnp.pad(b3.astype(f32), ((0, 0), (0, Ap - action_dim)))

    ma = jnp.asarray(max_action, dtype=f32).reshape(1, 1)

    grid = (Bp // TB,)
    const = lambda i: (0, 0)   # weights/biases: same block every step -> resident

    out_p = pl.pallas_call(
        _mlp_actor_kernel,
        out_shape=jax.ShapeDtypeStruct((Bp, Ap), f32),
        grid=grid,
        in_specs=[
            pl.BlockSpec(memory_space=pltpu.MemorySpace.SMEM),   # max_action
            pl.BlockSpec((TB, Kp), lambda i: (i, 0)),            # state tile
            pl.BlockSpec((Kp, Hp), const),                       # w1
            pl.BlockSpec((1, Hp), const),                        # b1
            pl.BlockSpec((Hp, Hp), const),                       # w2
            pl.BlockSpec((1, Hp), const),                        # b2
            pl.BlockSpec((Hp, Ap), const),                       # w3
            pl.BlockSpec((1, Ap), const),                        # b3
        ],
        out_specs=pl.BlockSpec((TB, Ap), lambda i: (i, 0)),
        compiler_params=pltpu.CompilerParams(
            dimension_semantics=("parallel",),
            vmem_limit_bytes=64 << 20),
    )(ma, state_p, w1_p, b1_p, w2_p, b2_p, w3_p, b3_p)

    return out_p[:B, :action_dim]


def init_mlp_actor_params(key, state_dim, action_dim, hidden_dim=256):
    """Deterministic init mimicking nn.Linear default U(-1/sqrt(fan_in), +)."""
    def linear(k, fan_in, fan_out):
        kw, kb = jax.random.split(k)
        bound = 1.0 / jnp.sqrt(fan_in)
        w = jax.random.uniform(kw, (fan_in, fan_out), jnp.float32, -bound, bound)
        b = jax.random.uniform(kb, (1, fan_out), jnp.float32, -bound, bound)
        return w, b

    k1, k2, k3 = jax.random.split(key, 3)
    w1, b1 = linear(k1, state_dim, hidden_dim)
    w2, b2 = linear(k2, hidden_dim, hidden_dim)
    w3, b3 = linear(k3, hidden_dim, action_dim)
    return {"w1": w1, "b1": b1, "w2": w2, "b2": b2, "w3": w3, "b3": b3}


def mlp_actor_reference(state, params, max_action):
    """Pure-JAX reference mirroring the kernel's bf16-weight / f32-accumulate
    numerics (weights cast to bf16, matmuls accumulate in f32)."""
    bf16 = jnp.bfloat16
    w1 = params["w1"].astype(bf16)
    w2 = params["w2"].astype(bf16)
    w3 = params["w3"].astype(bf16)
    h1 = jnp.dot(state.astype(bf16), w1, preferred_element_type=jnp.float32)
    h1 = jnp.maximum(h1 + params["b1"], 0.0)
    h2 = jnp.dot(h1.astype(bf16), w2, preferred_element_type=jnp.float32)
    h2 = jnp.maximum(h2 + params["b2"], 0.0)
    h3 = jnp.dot(h2.astype(bf16), w3, preferred_element_type=jnp.float32)
    return max_action * jnp.tanh(h3 + params["b3"])


if __name__ == "__main__":
    key = jax.random.PRNGKey(0)
    k_params, k_state = jax.random.split(key)

    batch = 8
    state_dim = 16
    action_dim = 8
    hidden_dim = 256
    max_action = 2.0

    params = init_mlp_actor_params(k_params, state_dim, action_dim, hidden_dim)
    state = jax.random.normal(k_state, (batch, state_dim), jnp.float32)

    out = mlp_actor_forward(state, params, max_action)
    out = jax.block_until_ready(out)

    ref = mlp_actor_reference(state, params, max_action)
    assert out.shape == (batch, action_dim)
    assert jnp.allclose(out, ref, atol=1e-3, rtol=1e-3), (
        float(jnp.max(jnp.abs(out - ref))))

    print("KERNEL_OK")
</pallas_src>

<mosaic_0001>
module attributes {stable_mosaic.version = 11 : i64} {
  func.func @_mlp_actor_kernel(%arg0: i32, %arg1: memref<1x1xf32, #tpu.memory_space<smem>>, %arg2: memref<8x128xf32, #tpu.memory_space<vmem>>, %arg3: memref<128x256xbf16, #tpu.memory_space<vmem>>, %arg4: memref<1x256xf32, #tpu.memory_space<vmem>>, %arg5: memref<256x256xbf16, #tpu.memory_space<vmem>>, %arg6: memref<1x256xf32, #tpu.memory_space<vmem>>, %arg7: memref<256x128xbf16, #tpu.memory_space<vmem>>, %arg8: memref<1x128xf32, #tpu.memory_space<vmem>>, %arg9: memref<8x128xf32, #tpu.memory_space<vmem>>) attributes {dimension_semantics = [#tpu.dimension_semantics<parallel>], iteration_bounds = array<i64: 1>, scalar_prefetch = 0 : i64, scratch_operands = 0 : i64, tpu.core_type = #tpu.core_type<tc>, window_params = [{transform_indices = @transform_0, window_bounds = array<i64: 1, 1>}, {transform_indices = @transform_1, window_bounds = array<i64: 8, 128>}, {pipeline_mode = #tpu.pipeline_mode<synchronous>, transform_indices = @transform_2, window_bounds = array<i64: 128, 256>}, {pipeline_mode = #tpu.pipeline_mode<synchronous>, transform_indices = @transform_3, window_bounds = array<i64: 1, 256>}, {pipeline_mode = #tpu.pipeline_mode<synchronous>, transform_indices = @transform_4, window_bounds = array<i64: 256, 256>}, {pipeline_mode = #tpu.pipeline_mode<synchronous>, transform_indices = @transform_5, window_bounds = array<i64: 1, 256>}, {pipeline_mode = #tpu.pipeline_mode<synchronous>, transform_indices = @transform_6, window_bounds = array<i64: 256, 128>}, {pipeline_mode = #tpu.pipeline_mode<synchronous>, transform_indices = @transform_7, window_bounds = array<i64: 1, 128>}, {transform_indices = @transform_8, window_bounds = array<i64: 8, 128>}]} {
    %c0 = arith.constant 0 : index
    %c0_0 = arith.constant 0 : index
    %0 = memref.load %arg1[%c0, %c0_0] : memref<1x1xf32, #tpu.memory_space<smem>>
    %c0_1 = arith.constant 0 : index
    %c0_2 = arith.constant 0 : index
    %1 = vector.load %arg2[%c0_1, %c0_2] : memref<8x128xf32, #tpu.memory_space<vmem>>, vector<8x128xf32>
    %2 = arith.truncf %1 : vector<8x128xf32> to vector<8x128xbf16>
    %c0_3 = arith.constant 0 : index
    %c0_4 = arith.constant 0 : index
    %3 = vector.load %arg3[%c0_3, %c0_4] : memref<128x256xbf16, #tpu.memory_space<vmem>>, vector<128x256xbf16>
    %cst = arith.constant dense<0.000000e+00> : vector<8x256xf32>
    %4 = tpu.matmul %2, %3, %cst {dimension_numbers = #tpu.dot_dimension_numbers<[1], [0], [0], [1], [0, 0, 1, 1], [], []>} : vector<8x128xbf16>, vector<128x256xbf16>, vector<8x256xf32> -> vector<8x256xf32>
    %c0_5 = arith.constant 0 : index
    %c0_6 = arith.constant 0 : index
    %5 = vector.load %arg4[%c0_5, %c0_6] : memref<1x256xf32, #tpu.memory_space<vmem>>, vector<1x256xf32>
    %6 = vector.broadcast %5 : vector<1x256xf32> to vector<8x256xf32>
    %7 = arith.addf %4, %6 : vector<8x256xf32>
    %cst_7 = arith.constant 0.000000e+00 : f32
    %8 = vector.broadcast %cst_7 : f32 to vector<8x256xf32>
    %9 = arith.maximumf %7, %8 : vector<8x256xf32>
    %10 = arith.truncf %9 : vector<8x256xf32> to vector<8x256xbf16>
    %c0_8 = arith.constant 0 : index
    %c0_9 = arith.constant 0 : index
    %11 = vector.load %arg5[%c0_8, %c0_9] : memref<256x256xbf16, #tpu.memory_space<vmem>>, vector<256x256xbf16>
    %cst_10 = arith.constant dense<0.000000e+00> : vector<8x256xf32>
    %12 = tpu.matmul %10, %11, %cst_10 {dimension_numbers = #tpu.dot_dimension_numbers<[1], [0], [0], [1], [0, 0, 1, 1], [], []>} : vector<8x256xbf16>, vector<256x256xbf16>, vector<8x256xf32> -> vector<8x256xf32>
    %c0_11 = arith.constant 0 : index
    %c0_12 = arith.constant 0 : index
    %13 = vector.load %arg6[%c0_11, %c0_12] : memref<1x256xf32, #tpu.memory_space<vmem>>, vector<1x256xf32>
    %14 = vector.broadcast %13 : vector<1x256xf32> to vector<8x256xf32>
    %15 = arith.addf %12, %14 : vector<8x256xf32>
    %cst_13 = arith.constant 0.000000e+00 : f32
    %16 = vector.broadcast %cst_13 : f32 to vector<8x256xf32>
    %17 = arith.maximumf %15, %16 : vector<8x256xf32>
    %18 = arith.truncf %17 : vector<8x256xf32> to vector<8x256xbf16>
    %c0_14 = arith.constant 0 : index
    %c0_15 = arith.constant 0 : index
    %19 = vector.load %arg7[%c0_14, %c0_15] : memref<256x128xbf16, #tpu.memory_space<vmem>>, vector<256x128xbf16>
    %cst_16 = arith.constant dense<0.000000e+00> : vector<8x128xf32>
    %20 = tpu.matmul %18, %19, %cst_16 {dimension_numbers = #tpu.dot_dimension_numbers<[1], [0], [0], [1], [0, 0, 1, 1], [], []>} : vector<8x256xbf16>, vector<256x128xbf16>, vector<8x128xf32> -> vector<8x128xf32>
    %c0_17 = arith.constant 0 : index
    %c0_18 = arith.constant 0 : index
    %21 = vector.load %arg8[%c0_17, %c0_18] : memref<1x128xf32, #tpu.memory_space<vmem>>, vector<1x128xf32>
    %22 = vector.broadcast %21 : vector<1x128xf32> to vector<8x128xf32>
    %23 = arith.addf %20, %22 : vector<8x128xf32>
    %24 = math.tanh %23 : vector<8x128xf32>
    %25 = vector.broadcast %0 : f32 to vector<8x128xf32>
    %26 = arith.mulf %25, %24 : vector<8x128xf32>
    %c0_19 = arith.constant 0 : index
    %c0_20 = arith.constant 0 : index
    %27 = vector.load %arg9[%c0_19, %c0_20] : memref<8x128xf32, #tpu.memory_space<vmem>>, vector<8x128xf32>
    tpu.vector_store %arg9[%c0_19, %c0_20], %26 {strides = array<i32>} : memref<8x128xf32, #tpu.memory_space<vmem>>, vector<8x128xf32>,
    return
  }
  func.func @transform_0(%arg0: i32) -> (i32, i32) {
    %c0_i32 = arith.constant 0 : i32
    %c0_i32_0 = arith.constant 0 : i32
    %c0_i32_1 = arith.constant 0 : i32
    return %c0_i32, %c0_i32_0 : i32, i32
  }
  func.func @transform_1(%arg0: i32) -> (i32, i32) {
    %c0_i32 = arith.constant 0 : i32
    %c0_i32_0 = arith.constant 0 : i32
    return %arg0, %c0_i32 : i32, i32
  }
  func.func @transform_2(%arg0: i32) -> (i32, i32) {
    %c0_i32 = arith.constant 0 : i32
    %c0_i32_0 = arith.constant 0 : i32
    %c0_i32_1 = arith.constant 0 : i32
    return %c0_i32, %c0_i32_0 : i32, i32
  }
  func.func @transform_3(%arg0: i32) -> (i32, i32) {
    %c0_i32 = arith.constant 0 : i32
    %c0_i32_0 = arith.constant 0 : i32
    %c0_i32_1 = arith.constant 0 : i32
    return %c0_i32, %c0_i32_0 : i32, i32
  }
  func.func @transform_4(%arg0: i32) -> (i32, i32) {
    %c0_i32 = arith.constant 0 : i32
    %c0_i32_0 = arith.constant 0 : i32
    %c0_i32_1 = arith.constant 0 : i32
    return %c0_i32, %c0_i32_0 : i32, i32
  }
  func.func @transform_5(%arg0: i32) -> (i32, i32) {
    %c0_i32 = arith.constant 0 : i32
    %c0_i32_0 = arith.constant 0 : i32
    %c0_i32_1 = arith.constant 0 : i32
    return %c0_i32, %c0_i32_0 : i32, i32
  }
  func.func @transform_6(%arg0: i32) -> (i32, i32) {
    %c0_i32 = arith.constant 0 : i32
    %c0_i32_0 = arith.constant 0 : i32
    %c0_i32_1 = arith.constant 0 : i32
    return %c0_i32, %c0_i32_0 : i32, i32
  }
  func.func @transform_7(%arg0: i32) -> (i32, i32) {
    %c0_i32 = arith.constant 0 : i32
    %c0_i32_0 = arith.constant 0 : i32
    %c0_i32_1 = arith.constant 0 : i32
    return %c0_i32, %c0_i32_0 : i32, i32
  }
  func.func @transform_8(%arg0: i32) -> (i32, i32) {
    %c0_i32 = arith.constant 0 : i32
    %c0_i32_0 = arith.constant 0 : i32
    return %arg0, %c0_i32 : i32, i32
  }
}

</mosaic_0001>

<bundles_post_ra>
// kernel: tpu_custom_call.1
= control target key start
LH: loop header
LB: loop body
LE: loop exit
PB: predicated region body
PF: predicated region fallthrough
CT: control target
= control target key end

     0   :  { %14 = vsyncpa [#allocation4], 0  ;;  %s1254_s0 = inlined_call_operand.<no memory space> [shape: f32[1,1], index: 0, kind: input, shape index: {}]   ;;  %s1255_s1 = inlined_call_operand.hbm [shape: f32[8,128], index: 1, kind: input, shape index: {}]   ;;  %s1256_s2 = inlined_call_operand.hbm [shape: bf16[128,256], index: 2, kind: input, shape index: {}]   ;;  %s1257_s3 = inlined_call_operand.hbm [shape: f32[1,256], index: 3, kind: input, shape index: {}]   ;;  %s1258_s4 = inlined_call_operand.hbm [shape: bf16[256,256], index: 4, kind: input, shape index: {}]   ;;  %s1259_s5 = inlined_call_operand.hbm [shape: f32[1,256], index: 5, kind: input, shape index: {}]   ;;  %s1260_s6 = inlined_call_operand.hbm [shape: bf16[256,128], index: 6, kind: input, shape index: {}]   ;;  %s1261_s7 = inlined_call_operand.hbm [shape: f32[1,128], index: 7, kind: input, shape index: {}]   ;;  %s1262_s8 = inlined_call_operand.hbm [shape: f32[8,128], index: 8, kind: output, shape index: {}]  }
   0x1   :  { %15 = vsyncpa [#allocation7], 0 }
   0x2   :  { %16 = vsyncpa [#allocation10], 0 }
   0x3   :  { %17 = vsyncpa [#allocation13], 0 }
   0x4   :  { %18 = vsyncpa [#allocation5], 0  ;;  %s1097_s27 = smov [#allocation6]   ;;  %s911_s9 = scalar_lea.hbm %s1256_s2, 2048 }
   0x5   :  { %s36_s28 = sshll.u32 %s1097_s27, 4  ;;  %p912_p0 = scmp.ne.s32.totalorder %s1256_s2, %s911_s9  ;;  %s37_s28 = int_to_ptr.vmem [resolvable:$true] %s36_s28 }
   0x6   :  { %p915_p1 = scmp.lt.u32.totalorder %s911_s9, %s1256_s2 }
   0x8   :  { %p917_p2 = pnand %p915_p1, %p912_p0 }
   0xa   :  { %920 = shalt.err (!%p917_p2)
}
   0xb   :  { %s921_s14 = scalar_lea.vmem %s37_s28, 2048  ;;  %p926_p4 = scmp.lt.s32.totalorder %s37_s28, %s37_s28 }
   0xc   :  { %p922_p3 = scmp.ne.s32.totalorder %s37_s28, %s921_s14  ;;  %p927_p5 = scmp.lt.s32.totalorder %s921_s14, %s921_s14 }
   0xe   :  { %p928_p6 = por %p927_p5, %p926_p4 }
  0x10   :  { %p929_p7 = pnand %p928_p6, %p922_p3 }
  0x12   :  { %932 = shalt.err (!%p929_p7)
}
  0x13   :  { %s1098_s15 = smov 128   ;;  %s1099_s16 = smov 8  }
  0x14   :  { %42 = dma.hbm_to_vmem [thread:$0]  %s1256_s2, 2048, %s37_s28, [#allocation7], %s1098_s15, %s1098_s15, %s1099_s16  }
  0x15   :  { %s1100_s19 = smov [#allocation9]   ;;  %s1101_s21 = smov [#allocation12]  }
  0x16   :  { %s58_s20 = sshll.u32 %s1100_s19, 4  ;;  %s80_s22 = sshll.u32 %s1101_s21, 4  ;;  %s59_s20 = int_to_ptr.vmem [resolvable:$true] %s58_s20  ;;  %s81_s22 = int_to_ptr.vmem [resolvable:$true] %s80_s22 }
  0x17   :  { %s933_s25 = scalar_lea.hbm %s1258_s4, 4096 }
  0x18   :  { %p934_p8 = scmp.ne.s32.totalorder %s1258_s4, %s933_s25  ;;  %p937_p9 = scmp.lt.u32.totalorder %s933_s25, %s1258_s4 }
  0x1a   :  { %p939_p10 = pnand %p937_p9, %p934_p8 }
  0x1c   :  { %942 = shalt.err (!%p939_p10)
}
  0x1d   :  { %s943_s2 = scalar_lea.vmem %s59_s20, 4096  ;;  %p948_p12 = scmp.lt.s32.totalorder %s59_s20, %s59_s20 }
  0x1e   :  { %p944_p11 = scmp.ne.s32.totalorder %s59_s20, %s943_s2  ;;  %p949_p13 = scmp.lt.s32.totalorder %s943_s2, %s943_s2 }
  0x20   :  { %p950_p0 = por %p949_p13, %p948_p12 }
  0x22   :  { %p951_p1 = pnand %p950_p0, %p944_p11 }
  0x24   :  { %954 = shalt.err (!%p951_p1)
}
  0x25   :  { %64 = dma.hbm_to_vmem [thread:$0]  %s1258_s4, 4096, %s59_s20, [#allocation10], %s1098_s15, %s1098_s15, %s1099_s16  }
  0x26   :  { %s955_s12 = scalar_lea.hbm %s1260_s6, 2048 }
  0x27   :  { %p956_p2 = scmp.ne.s32.totalorder %s1260_s6, %s955_s12  ;;  %p959_p3 = scmp.lt.u32.totalorder %s955_s12, %s1260_s6 }
  0x29   :  { %p961_p4 = pnand %p959_p3, %p956_p2 }
  0x2b   :  { %964 = shalt.err (!%p961_p4)
}
  0x2c   :  { %s965_s19 = scalar_lea.vmem %s81_s22, 2048  ;;  %p970_p6 = scmp.lt.s32.totalorder %s81_s22, %s81_s22 }
  0x2d   :  { %p966_p5 = scmp.ne.s32.totalorder %s81_s22, %s965_s19  ;;  %p971_p7 = scmp.lt.s32.totalorder %s965_s19, %s965_s19 }
  0x2f   :  { %p972_p8 = por %p971_p7, %p970_p6 }
  0x31   :  { %p973_p9 = pnand %p972_p8, %p966_p5 }
  0x33   :  { %976 = shalt.err (!%p973_p9)
}
  0x34   :  { %s1102_s4 = smov 64   ;;  %s1103_s15 = smov 4  }
  0x35   :  { %86 = dma.hbm_to_vmem [thread:$0]  %s1260_s6, 2048, %s81_s22, [#allocation13], %s1102_s4, %s1102_s4, %s1103_s15  }
  0x36   :  { %s1104_s21 = smov [#allocation3]   ;;  %s1105_s24 = smov [#allocation8]  }
  0x37   :  { %s27_s23 = sshll.u32 %s1104_s21, 4  ;;  %s49_s25 = sshll.u32 %s1105_s24, 4  ;;  %s28_s23 = int_to_ptr.vmem [resolvable:$true] %s27_s23  ;;  %s50_s25 = int_to_ptr.vmem [resolvable:$true] %s49_s25 }
  0x38   :  { %s977_s29 = scalar_lea.hbm %s1255_s1, 128 }
  0x39   :  { %p978_p10 = scmp.ne.s32.totalorder %s1255_s1, %s977_s29  ;;  %p981_p11 = scmp.lt.u32.totalorder %s977_s29, %s1255_s1 }
  0x3b   :  { %p983_p12 = pnand %p981_p11, %p978_p10 }
  0x3d   :  { %986 = shalt.err (!%p983_p12)
}
  0x3e   :  { %s987_s6 = scalar_lea.vmem %s28_s23, 128  ;;  %p992_p0 = scmp.lt.s32.totalorder %s28_s23, %s28_s23 }
  0x3f   :  { %p988_p13 = scmp.ne.s32.totalorder %s28_s23, %s987_s6  ;;  %p993_p1 = scmp.lt.s32.totalorder %s987_s6, %s987_s6 }
  0x41   :  { %p994_p2 = por %p993_p1, %p992_p0 }
  0x43   :  { %p995_p3 = pnand %p994_p2, %p988_p13 }
  0x45   :  { %998 = shalt.err (!%p995_p3)
}
  0x46   :  { %30 = dma.hbm_to_vmem [thread:$0]  %s1255_s1, 128, %s28_s23, [#allocation4]  }
  0x47   :  { %s999_s13 = scalar_lea.hbm %s1257_s3, 32 }
  0x48   :  { %p1000_p4 = scmp.ne.s32.totalorder %s1257_s3, %s999_s13  ;;  %p1003_p5 = scmp.lt.u32.totalorder %s999_s13, %s1257_s3 }
  0x4a   :  { %p1005_p6 = pnand %p1003_p5, %p1000_p4 }
  0x4c   :  { %1008 = shalt.err (!%p1005_p6)
}
  0x4d   :  { %s1009_s4 = scalar_lea.vmem %s50_s25, 32  ;;  %p1014_p8 = scmp.lt.s32.totalorder %s50_s25, %s50_s25 }
  0x4e   :  { %p1010_p7 = scmp.ne.s32.totalorder %s50_s25, %s1009_s4  ;;  %p1015_p9 = scmp.lt.s32.totalorder %s1009_s4, %s1009_s4 }
  0x50   :  { %p1016_p10 = por %p1015_p9, %p1014_p8 }
  0x52   :  { %p1017_p11 = pnand %p1016_p10, %p1010_p7 }
  0x54   :  { %1020 = shalt.err (!%p1017_p11)
}
  0x55   :  { %52 = dma.hbm_to_vmem [thread:$0]  %s1257_s3, 32, %s50_s25, [#allocation7]  }
  0x56   :  { %s1106_s16 = smov [#allocation11]   ;;  %s1107_s21 = smov [#allocation14]  }
  0x57   :  { %s71_s20 = sshll.u32 %s1106_s16, 4  ;;  %s93_s23 = sshll.u32 %s1107_s21, 4  ;;  %s72_s20 = int_to_ptr.vmem [resolvable:$true] %s71_s20  ;;  %s94_s23 = int_to_ptr.vmem [resolvable:$true] %s93_s23 }
  0x58   :  { %s1021_s27 = scalar_lea.hbm %s1259_s5, 32 }
  0x59   :  { %p1022_p12 = scmp.ne.s32.totalorder %s1259_s5, %s1021_s27  ;;  %p1025_p13 = scmp.lt.u32.totalorder %s1021_s27, %s1259_s5 }
  0x5b   :  { %p1027_p0 = pnand %p1025_p13, %p1022_p12 }
  0x5d   :  { %1030 = shalt.err (!%p1027_p0)
}
  0x5e   :  { %s1031_s3 = scalar_lea.vmem %s72_s20, 32  ;;  %p1036_p2 = scmp.lt.s32.totalorder %s72_s20, %s72_s20 }
  0x5f   :  { %p1032_p1 = scmp.ne.s32.totalorder %s72_s20, %s1031_s3  ;;  %p1037_p3 = scmp.lt.s32.totalorder %s1031_s3, %s1031_s3 }
  0x61   :  { %p1038_p4 = por %p1037_p3, %p1036_p2 }
  0x63   :  { %p1039_p5 = pnand %p1038_p4, %p1032_p1 }
  0x65   :  { %1042 = shalt.err (!%p1039_p5)
}
  0x66   :  { %74 = dma.hbm_to_vmem [thread:$0]  %s1259_s5, 32, %s72_s20, [#allocation10]  }
  0x67   :  { %s1043_s10 = scalar_lea.hbm %s1261_s7, 16 }
  0x68   :  { %p1044_p6 = scmp.ne.s32.totalorder %s1261_s7, %s1043_s10  ;;  %p1047_p7 = scmp.lt.u32.totalorder %s1043_s10, %s1261_s7 }
  0x6a   :  { %p1049_p8 = pnand %p1047_p7, %p1044_p6 }
  0x6c   :  { %1052 = shalt.err (!%p1049_p8)
}
  0x6d   :  { %s1053_s17 = scalar_lea.vmem %s94_s23, 16  ;;  %s1057_s18 = scalar_lea.vmem %s94_s23, 32 }
  0x6e   :  { %p1054_p9 = scmp.ne.s32.totalorder %s94_s23, %s1053_s17  ;;  %p1058_p10 = scmp.lt.s32.totalorder %s94_s23, %s94_s23 }
  0x6f   :  { %p1059_p11 = scmp.lt.s32.totalorder %s1057_s18, %s1053_s17 }
  0x71   :  { %p1060_p12 = por %p1059_p11, %p1058_p10 }
  0x73   :  { %p1061_p13 = pnand %p1060_p12, %p1054_p9 }
  0x75   :  { %1064 = shalt.err (!%p1061_p13)
}
  0x76   :  { %96 = dma.hbm_to_vmem [thread:$0]  %s1261_s7, 16, %s94_s23, [#allocation13]  }
  0x77   :  { %1087 = dma.done.wait [#allocation4], 128  }
  0x78   :  { %1088 = vsyncadd [#allocation4], 4294967168 }
  0x79   :  { %1089 = dma.done.wait [#allocation7], 2080  }
  0x7a   :  { %1090 = vsyncadd [#allocation7], 4294965216 }
  0x7b   :  { %1091 = dma.done.wait [#allocation10], 4128  }
  0x7c   :  { %1092 = vsyncadd [#allocation10], 4294963168 }
  0x7d   :  { %1093 = dma.done.wait [#allocation13], 2064  }
  0x7e   :  { %1094 = vsyncadd [#allocation13], 4294965232  ;;  %v1108_v0 = vmov 0   ;;  %v821_v1 = vld [vmem:[#allocation6 + $0x4] ss:$8 sps:$4 sm:$0xff]   ;;  %v120_v26 = vld [vmem:[#allocation3] sm:$0xff]  ;;  %v140_v63 = vlaneseq }
  0x7f   :  { %262 = vmatprep.mubr.bf16.mxu0 %v1108_v0  ;;  %v823_v2 = vld [vmem:[#allocation6] ss:$8 sps:$4 sm:$0xff]   ;;  %230 = vmatprep.subr.bf16.mxu0 %v821_v1  ;;  %v824_v3 = vld [vmem:[#allocation6 + $0x14] ss:$8 sps:$4 sm:$0xff]   ;;  %v826_v4 = vld [vmem:[#allocation6 + $0x10] ss:$8 sps:$4 sm:$0xff]   ;;  %v121_v31 = vpack.c.bf16 %v120_v26, %v120_v26 }
  0x80   :  { %231 = vmatpush1.bf16.msra.mxu0 %v823_v2  ;;  %v827_v5 = vld [vmem:[#allocation6 + $0x24] ss:$8 sps:$4 sm:$0xff]   ;;  %v829_v6 = vld [vmem:[#allocation6 + $0x20] ss:$8 sps:$4 sm:$0xff]   ;;  %v830_v7 = vld [vmem:[#allocation6 + $0x34] ss:$8 sps:$4 sm:$0xff]  }
  0x81   :  { %232 = vmatprep.subr.bf16.mxu0 %v824_v3  ;;  %v832_v8 = vld [vmem:[#allocation6 + $0x30] ss:$8 sps:$4 sm:$0xff]   ;;  %v833_v9 = vld [vmem:[#allocation6 + $0x44] ss:$8 sps:$4 sm:$0xff]   ;;  %v835_v13 = vld [vmem:[#allocation6 + $0x40] ss:$8 sps:$4 sm:$0xff]  }
  0x82   :  { %v845_v10 = vld [vmem:[#allocation9 + $0x4] ss:$8 sps:$4 sm:$0xff]   ;;  %v847_v11 = vld [vmem:[#allocation9] ss:$8 sps:$4 sm:$0xff]   ;;  %v848_v12 = vld [vmem:[#allocation9 + $0x14] ss:$8 sps:$4 sm:$0xff]  }
  0x83   :  { %479 = vmatprep.subr.bf16.mxu1 %v845_v10  ;;  %v850_v14 = vld [vmem:[#allocation9 + $0x10] ss:$8 sps:$4 sm:$0xff]   ;;  %v851_v15 = vld [vmem:[#allocation9 + $0x24] ss:$8 sps:$4 sm:$0xff]   ;;  %v853_v18 = vld [vmem:[#allocation9 + $0x20] ss:$8 sps:$4 sm:$0xff]  }
  0x84   :  { %233 = vmatpush1.bf16.msra.mxu0 %v826_v4  ;;  %480 = vmatpush1.bf16.msra.mxu1 %v847_v11  ;;  %v836_v16 = vld [vmem:[#allocation6 + $0x54] ss:$8 sps:$4 sm:$0xff]   ;;  %v838_v17 = vld [vmem:[#allocation6 + $0x50] ss:$8 sps:$4 sm:$0xff]   ;;  %v839_v20 = vld [vmem:[#allocation6 + $0x64] ss:$8 sps:$4 sm:$0xff]  }
  0x85   :  { %234 = vmatprep.subr.bf16.mxu0 %v827_v5  ;;  %481 = vmatprep.subr.bf16.mxu1 %v848_v12  ;;  %v854_v19 = vld [vmem:[#allocation9 + $0x34] ss:$8 sps:$4 sm:$0xff]   ;;  %v856_v22 = vld [vmem:[#allocation9 + $0x30] ss:$8 sps:$4 sm:$0xff]   ;;  %v857_v23 = vld [vmem:[#allocation9 + $0x44] ss:$8 sps:$4 sm:$0xff]  }
  0x86   :  { %v841_v21 = vld [vmem:[#allocation6 + $0x60] ss:$8 sps:$4 sm:$0xff]   ;;  %v842_v24 = vld [vmem:[#allocation6 + $0x74] ss:$8 sps:$4 sm:$0xff]   ;;  %v844_v25 = vld [vmem:[#allocation6 + $0x70] ss:$8 sps:$4 sm:$0xff]  }
  0x87   :  { %v859_v27 = vld [vmem:[#allocation9 + $0x40] ss:$8 sps:$4 sm:$0xff]   ;;  %v860_v28 = vld [vmem:[#allocation9 + $0x54] ss:$8 sps:$4 sm:$0xff]   ;;  %v862_v29 = vld [vmem:[#allocation9 + $0x50] ss:$8 sps:$4 sm:$0xff]  }
  0x88   :  { %235 = vmatpush1.bf16.msra.mxu0 %v829_v6  ;;  %482 = vmatpush1.bf16.msra.mxu1 %v850_v14  ;;  %v863_v30 = vld [vmem:[#allocation9 + $0x64] ss:$8 sps:$4 sm:$0xff]   ;;  %v865_v32 = vld [vmem:[#allocation9 + $0x60] ss:$8 sps:$4 sm:$0xff]   ;;  %v866_v33 = vld [vmem:[#allocation9 + $0x74] ss:$8 sps:$4 sm:$0xff]  }
  0x89   :  { %236 = vmatprep.subr.bf16.mxu0 %v830_v7  ;;  %483 = vmatprep.subr.bf16.mxu1 %v851_v15  ;;  %v868_v34 = vld [vmem:[#allocation9 + $0x70] ss:$8 sps:$4 sm:$0xff]   ;;  %v869_v35 = vld [vmem:[#allocation9 + $0x84] ss:$8 sps:$4 sm:$0xff]   ;;  %v871_v36 = vld [vmem:[#allocation9 + $0x80] ss:$8 sps:$4 sm:$0xff]  }
  0x8a   :  { %v872_v37 = vld [vmem:[#allocation9 + $0x94] ss:$8 sps:$4 sm:$0xff]   ;;  %v874_v38 = vld [vmem:[#allocation9 + $0x90] ss:$8 sps:$4 sm:$0xff]   ;;  %v875_v39 = vld [vmem:[#allocation9 + $0xa4] ss:$8 sps:$4 sm:$0xff]  }
  0x8b   :  { %v877_v40 = vld [vmem:[#allocation9 + $0xa0] ss:$8 sps:$4 sm:$0xff]   ;;  %v878_v41 = vld [vmem:[#allocation9 + $0xb4] ss:$8 sps:$4 sm:$0xff]   ;;  %v880_v42 = vld [vmem:[#allocation9 + $0xb0] ss:$8 sps:$4 sm:$0xff]  }
  0x8c   :  { %237 = vmatpush1.bf16.msra.mxu0 %v832_v8  ;;  %484 = vmatpush1.bf16.msra.mxu1 %v853_v18  ;;  %v881_v43 = vld [vmem:[#allocation9 + $0xc4] ss:$8 sps:$4 sm:$0xff]   ;;  %v883_v44 = vld [vmem:[#allocation9 + $0xc0] ss:$8 sps:$4 sm:$0xff]   ;;  %v884_v45 = vld [vmem:[#allocation9 + $0xd4] ss:$8 sps:$4 sm:$0xff]  }
  0x8d   :  { %238 = vmatprep.subr.bf16.mxu0 %v833_v9  ;;  %485 = vmatprep.subr.bf16.mxu1 %v854_v19  ;;  %v886_v46 = vld [vmem:[#allocation9 + $0xd0] ss:$8 sps:$4 sm:$0xff]   ;;  %v887_v47 = vld [vmem:[#allocation9 + $0xe4] ss:$8 sps:$4 sm:$0xff]   ;;  %v889_v48 = vld [vmem:[#allocation9 + $0xe0] ss:$8 sps:$4 sm:$0xff]  }
  0x8e   :  { %v890_v49 = vld [vmem:[#allocation9 + $0xf4] ss:$8 sps:$4 sm:$0xff]   ;;  %v892_v50 = vld [vmem:[#allocation9 + $0xf0] ss:$8 sps:$4 sm:$0xff]   ;;  %v893_v51 = vld [vmem:[#allocation12 + $0x40] sm:$0xff]   ;;  %v141_v0 = vshrl.u32 %v140_v63, 7 }
  0x8f   :  { %v894_v52 = vld [vmem:[#allocation12] sm:$0xff]   ;;  %v895_v53 = vld [vmem:[#allocation12 + $0x48] sm:$0xff]   ;;  %v897_v55 = vld [vmem:[#allocation12 + $0x50] sm:$0xff]   ;;  %s1109_s1 = smov [#allocation15]  }
  0x90   :  { %239 = vmatpush1.bf16.msra.mxu0 %v835_v13  ;;  %486 = vmatpush1.bf16.msra.mxu1 %v856_v22  ;;  %v896_v54 = vld [vmem:[#allocation12 + $0x8] sm:$0xff]   ;;  %v898_v56 = vld [vmem:[#allocation12 + $0x10] sm:$0xff]   ;;  %v899_v57 = vld [vmem:[#allocation12 + $0x58] sm:$0xff]   ;;  %v142_v1 = vsub.s32 0, %v141_v0  ;;  %v146_v3 = vsub.s32 1, %v141_v0  ;;  %s709_s15 = sshll.u32 %s1109_s1, 4  ;;  %s710_s15 = int_to_ptr.vmem [resolvable:$true] %s709_s15 }
  0x91   :  { %240 = vmatprep.subr.bf16.mxu0 %v836_v16  ;;  %487 = vmatprep.subr.bf16.mxu1 %v857_v23  ;;  %v900_v58 = vld [vmem:[#allocation12 + $0x18] sm:$0xff]   ;;  %v901_v59 = vld [vmem:[#allocation12 + $0x60] sm:$0xff]   ;;  %v903_v61 = vld [vmem:[#allocation12 + $0x68] sm:$0xff]   ;;  %s1065_s16 = scalar_lea.vmem %s710_s15, 128  ;;  %p1070_p1 = scmp.lt.s32.totalorder %s710_s15, %s710_s15 }
  0x92   :  { %v902_v60 = vld [vmem:[#allocation12 + $0x20] sm:$0xff]   ;;  %v904_v62 = vld [vmem:[#allocation12 + $0x28] sm:$0xff]   ;;  %v138_v2 = vld [vmem:[#allocation8] sm:$0x3]  ;;  %p1066_p0 = scmp.ne.s32.totalorder %s710_s15, %s1065_s16  ;;  %p1071_p2 = scmp.lt.s32.totalorder %s1065_s16, %s1065_s16 }
  0x93   :  { %v143_v4 = vrot.slane %v138_v2, %v142_v1  ;;  %v147_v5 = vrot.slane %v138_v2, %v146_v3  ;;  %v905_v16 = vld [vmem:[#allocation12 + $0x70] sm:$0xff]   ;;  %v907_v18 = vld [vmem:[#allocation12 + $0x78] sm:$0xff]  }
  0x94   :  { %241 = vmatpush1.bf16.msra.mxu0 %v838_v17  ;;  %488 = vmatpush1.bf16.msra.mxu1 %v859_v27  ;;  %v906_v17 = vld [vmem:[#allocation12 + $0x30] sm:$0xff]   ;;  %v908_v19 = vld [vmem:[#allocation12 + $0x38] sm:$0xff]   ;;  %p1072_p3 = por %p1071_p2, %p1070_p1 }
  0x95   :  { %242 = vmatprep.subr.bf16.mxu0 %v839_v20  ;;  %489 = vmatprep.subr.bf16.mxu1 %v860_v28  ;;  %v307_v20 = vld [vmem:[#allocation11] sm:$0x3] }
  0x96   :  { %v316_v22 = vrot.slane %v307_v20, %v146_v3  ;;  %p1073_p4 = pnand %p1072_p3, %p1066_p0 }
  0x98   :  { %243 = vmatpush1.bf16.msra.mxu0 %v841_v21  ;;  %490 = vmatpush1.bf16.msra.mxu1 %v862_v29  ;;  %v312_v21 = vrot.slane %v307_v20, %v142_v1 }
  0x99   :  { %244 = vmatprep.subr.bf16.mxu0 %v842_v24  ;;  %491 = vmatprep.subr.bf16.mxu1 %v863_v30 }
  0x9c   :  { %245 = vmatpush1.bf16.msra.mxu0 %v844_v25  ;;  %492 = vmatpush1.bf16.msra.mxu1 %v865_v32 }
  0x9d   :  { %493 = vmatprep.subr.bf16.mxu1 %v866_v33  ;;  %786 = vmatprep.subr.bf16.mxu0 %v893_v51 }
  0x9f   :  { %263 = vmatmul.mubr.bf16.vlgmr.msra.gmra.mrb[0].mxu0 %v121_v31 }
  0xa0   :  { %494 = vmatpush1.bf16.msra.mxu1 %v868_v34  ;;  %787 = vmatpush3.bf16.msra.mxu0 %v894_v52  ;;  %v769_v34 = vld [vmem:[#allocation14] ss:$0 sm:$0xff] }
  0xa1   :  { %495 = vmatprep.subr.bf16.mxu1 %v869_v35  ;;  %788 = vmatprep.subr.bf16.mxu0 %v895_v53 }
  0xa4   :  { %496 = vmatpush1.bf16.msra.mxu1 %v871_v36  ;;  %789 = vmatpush3.bf16.msra.mxu0 %v896_v54 }
  0xa5   :  { %497 = vmatprep.subr.bf16.mxu1 %v872_v37  ;;  %790 = vmatprep.subr.bf16.mxu0 %v897_v55 }
  0xa8   :  { %498 = vmatpush1.bf16.msra.mxu1 %v874_v38  ;;  %791 = vmatpush3.bf16.msra.mxu0 %v898_v56 }
  0xa9   :  { %499 = vmatprep.subr.bf16.mxu1 %v875_v39  ;;  %792 = vmatprep.subr.bf16.mxu0 %v899_v57 }
  0xac   :  { %500 = vmatpush1.bf16.msra.mxu1 %v877_v40  ;;  %793 = vmatpush3.bf16.msra.mxu0 %v900_v58  ;;  %v700_v40 = vstv %s1254_s0 }
  0xad   :  { %501 = vmatprep.subr.bf16.mxu1 %v878_v41  ;;  %794 = vmatprep.subr.bf16.mxu0 %v901_v59 }
  0xb0   :  { %502 = vmatpush1.bf16.msra.mxu1 %v880_v42  ;;  %795 = vmatpush3.bf16.msra.mxu0 %v902_v60 }
  0xb1   :  { %503 = vmatprep.subr.bf16.mxu1 %v881_v43  ;;  %796 = vmatprep.subr.bf16.mxu0 %v903_v61 }
  0xb4   :  { %504 = vmatpush1.bf16.msra.mxu1 %v883_v44  ;;  %797 = vmatpush3.bf16.msra.mxu0 %v904_v62 }
  0xb5   :  { %505 = vmatprep.subr.bf16.mxu1 %v884_v45  ;;  %798 = vmatprep.subr.bf16.mxu0 %v905_v16 }
  0xb8   :  { %506 = vmatpush1.bf16.msra.mxu1 %v886_v46  ;;  %799 = vmatpush3.bf16.msra.mxu0 %v906_v17 }
  0xb9   :  { %507 = vmatprep.subr.bf16.mxu1 %v887_v47  ;;  %800 = vmatprep.subr.bf16.mxu0 %v907_v18 }
  0xbc   :  { %508 = vmatpush1.bf16.msra.mxu1 %v889_v48  ;;  %801 = vmatpush3.bf16.msra.mxu0 %v908_v19 }
  0xbd   :  { %509 = vmatprep.subr.bf16.mxu1 %v890_v49 }
  0xc0   :  { %510 = vmatpush1.bf16.msra.mxu1 %v892_v50 }
 0x172   :  { %v264_v6 = vpop.f32.mrb[0].mxu0 }
 0x173   :  { %v265_v7 = vadd.f32 %v264_v6, %v143_v4  ;;  %v266_v8 = vpop.f32.mrb[1].mxu0 }
 0x174   :  { %v267_v9 = vadd.f32 %v266_v8, %v147_v5  ;;  %v268_v10 = vpop.f32.mrb[2].mxu0 }
 0x175   :  { %v271_v11 = vmax.f32 %v265_v7, 0.0  ;;  %v269_v12 = vpop.f32.mrb[3].mxu0 }
 0x176   :  { %v272_v13 = vmax.f32 %v267_v9, 0.0 }
 0x177   :  { %v273_v15 = vpack.c.bf16 %v271_v11, %v271_v11 }
 0x178   :  { %v274_v14 = vpack.c.bf16 %v272_v13, %v272_v13 }
 0x17a   :  { %511 = vmatprep.mubr.bf16.mxu1 %v274_v14 }
 0x17b   :  { %512 = vmatmul.mubr.bf16.vlgmr.msra.gmra.mrb[0].mxu1 %v273_v15 }
 0x24e   :  { %v513_v23 = vpop.f32.mrb[0].mxu1 }
 0x24f   :  { %v514_v24 = vadd.f32 %v513_v23, %v312_v21  ;;  %v515_v25 = vpop.f32.mrb[1].mxu1 }
 0x250   :  { %v516_v26 = vadd.f32 %v515_v25, %v316_v22  ;;  %v517_v27 = vpop.f32.mrb[2].mxu1 }
 0x251   :  { %v520_v28 = vmax.f32 %v514_v24, 0.0  ;;  %v518_v29 = vpop.f32.mrb[3].mxu1 }
 0x252   :  { %v521_v30 = vmax.f32 %v516_v26, 0.0 }
 0x253   :  { %v522_v32 = vpack.c.bf16 %v520_v28, %v520_v28 }
 0x254   :  { %v523_v31 = vpack.c.bf16 %v521_v30, %v521_v30 }
 0x256   :  { %691 = vmatprep.mubr.bf16.mxu0 %v523_v31 }
 0x257   :  { %692 = vmatmul.mubr.bf16.vlgmr.msra.gmra.mrb[4].mxu0 %v522_v32 }
 0x32a   :  { %v802_v33 = vpop.f32.mrb[4].mxu0 }
 0x32b   :  { %v803_v35 = vpop.f32.mrb[5].mxu0 }
 0x32c   :  { %v804_v36 = vadd.f32 %v803_v35, %v802_v33  ;;  %v805_v37 = vpop.f32.mrb[6].mxu0 }
 0x32d   :  { %v806_v38 = vpop.f32.mrb[7].mxu0 }
 0x32e   :  { %v694_v39 = vadd.f32 %v804_v36, %v769_v34 }
 0x330   :  { %909 = vtanh.f32 %v694_v39 }
 0x33a   :  { %v910_v41 = vpop.eup %909 }
 0x33b   :  { %v701_v42 = vmul.f32 %v910_v41, %v700_v40 }
 0x33d   :  { %702 = vst [vmem:[#allocation15] sm:$0xff] %v701_v42 }
 0x33e   :  { %1076 = shalt.err (!%p1073_p4)
}
 0x33f   :  { %s1077_s23 = scalar_lea.hbm %s1262_s8, 128 }
 0x340   :  { %p1078_p5 = scmp.ne.s32.totalorder %s1262_s8, %s1077_s23  ;;  %p1081_p6 = scmp.lt.u32.totalorder %s1077_s23, %s1262_s8 }
 0x342   :  { %p1083_p7 = pnand %p1081_p6, %p1078_p5 }
 0x344   :  { %1086 = shalt.err (!%p1083_p7)
}
 0x345   :  { %712 = dma.vmem_to_hbm [thread:$0]  %s710_s15, 128, %s1262_s8, [#allocation5]  }
 0x346   :  { %1095 = dma.done.wait [#allocation5], 128  }
 0x347   :  { %1096 = vsyncadd [#allocation5], 4294967168 }
 0x348   :  { %716 = vsyncpa [#allocation4], 1 }
 0x349   :  { %717 = vsyncpa [#allocation7], 1 }
 0x34a   :  { %718 = vsyncpa [#allocation10], 1 }
 0x34b   :  { %719 = vsyncpa [#allocation13], 1 }
 0x34c   :  { %720 = vsyncpa [#allocation5], 1 }

</bundles_post_ra>
